<compile_context>
chip_gen: v5e
topology: v5e:2x2
jax: 0.10.0
libtpu: 0.0.40
codegen_flags: <defaults>
</compile_context>

<pallas_src>
import jax
import jax.numpy as jnp
from jax.experimental import pallas as pl
from jax.experimental.pallas import tpu as pltpu


def _subsumption_kernel(
    ids_ref,      # [4B, S, 1] int32 : token ids, row-groups are [e1 | e2 | a1 | a2]
    smask_ref,    # [4B, S, 1] f32   : attention masks pre-scaled by 1/num_tokens
    table_ref,    # [V, H]     f32   : nn.Embedding weight (read once)
    We_ref,       # [H, H]     gating weight, entity half      (W_t[:H])
    Wa_ref,       # [H, H]     gating weight, annotation half  (W_t[H:])
    Wb_ref,       # [1, H]     gating bias
    CeT_ref,      # [2, H]     classifier rows, merged-entity-1 half (C_t[:H].T)
    CmT_ref,      # [2, H]     classifier rows, merged-entity-2 half (C_t[H:].T)
    cb_ref,       # [2]  f32   classifier bias (SMEM, scalar reads)
    lab_ref,      # [B, 1] int32 labels (values in {0,1})
    loss_ref,     # out: [1, 1] f32
    pred_ref,     # out: [1, B] int32 (lane-dense)
):
    four_b, S, _ = ids_ref.shape
    V = table_ref.shape[0]
    B = lab_ref.shape[0]
    two_b = 2 * B

    # --- fused nn.Embedding gather + masked-mean pooling --------------------
    # bow[g, v] = sum_t smask[g, t] * (ids[g, t] == v)   (weighted bag-of-words)
    # pooled    = bow @ table  ==  sum_t smask[g, t] * table[ids[g, t]]
    vocab_iota = jax.lax.broadcasted_iota(jnp.int32, (four_b, S, V), 2)
    onehot = (ids_ref[...] == vocab_iota).astype(jnp.float32)          # [4B,S,V]
    bow = jnp.sum(smask_ref[...] * onehot, axis=1)                     # [4B,V]
    pooled = jnp.dot(bow, table_ref[...],
                     preferred_element_type=jnp.float32)               # [4B,H]

    ent = pooled[:two_b]                               # (e1 ; e2)  [2B, H]
    ann = pooled[two_b:]                               # (a1 ; a2)  [2B, H]

    # --- gated fusion, both entities batched along M -------------------------
    # w = sigmoid([e; a] @ W + b) == sigmoid(e @ We + a @ Wa + b)   (no concat)
    w = jax.nn.sigmoid(
        jnp.dot(ent, We_ref[...], preferred_element_type=jnp.float32)
        + jnp.dot(ann, Wa_ref[...], preferred_element_type=jnp.float32)
        + Wb_ref[...])
    # folded algebra:  ent + (w*ent + (1-w)*ann)  ==  ent + ann + w*(ent - ann)
    merged = ent + ann + w * (ent - ann)                               # [2B,H]
    m1 = merged[:B]                                    # entity-1 merged [B, H]
    m2 = merged[B:]                                    # entity-2 merged [B, H]

    # TODO(synk): dropout omitted (p=0.0 / eval mode -> identity).

    # --- classifier (num_labels = 2): VPU weighted reductions, no MXU --------
    # logits[:, j] = m1 @ C_t[:H][:, j] + m2 @ C_t[H:][:, j] + C_b[j]
    l0 = jnp.sum(m1 * CeT_ref[0:1, :] + m2 * CmT_ref[0:1, :],
                 axis=-1, keepdims=True) + cb_ref[0]                   # [B,1]
    l1 = jnp.sum(m1 * CeT_ref[1:2, :] + m2 * CmT_ref[1:2, :],
                 axis=-1, keepdims=True) + cb_ref[1]                   # [B,1]

    # --- cross-entropy (mean reduction) over the two logit columns -----------
    mx = jnp.maximum(l0, l1)
    lse = mx + jnp.log(jnp.exp(l0 - mx) + jnp.exp(l1 - mx))            # [B,1]
    picked = jnp.where(lab_ref[...] == 1, l1, l0)      # labels assumed in {0,1}
    loss_ref[...] = jnp.mean(lse - picked).reshape(1, 1)

    # --- argmax over 2 classes, emitted lane-dense ----------------------------
    # [B,1] -> [1,B] relayout via a sublane-sum against an identity matrix
    # (all supported VPU/XLU ops; avoids masked column stores at large B).
    pred_col = (l1 > l0).astype(jnp.float32)                           # [B,1]
    eye = (jax.lax.broadcasted_iota(jnp.int32, (B, B), 0)
           == jax.lax.broadcasted_iota(jnp.int32, (B, B), 1)).astype(jnp.float32)
    pred_ref[...] = jnp.sum(pred_col * eye, axis=0,
                            keepdims=True).astype(jnp.int32)           # [1,B]


def subsumption_forward(ids1, mask1, ids2, mask2, aids1, amask1, aids2, amask2,
                        embed_table, W_t, W_b, C_t, C_b, labels):
    B, S = ids1.shape
    V, H = embed_table.shape

    # Stack only the tiny id / mask streams (4*B*S ints/floats, a few KB).
    # The [4B,S,H] activation-slab concat from the previous version is gone:
    # gathered embeddings are never materialized in HBM.
    ids = jnp.concatenate([ids1, ids2, aids1, aids2], axis=0).astype(jnp.int32)
    masks = jnp.concatenate([mask1, mask2, amask1, amask2],
                            axis=0).astype(jnp.float32)                # [4B,S]

    # Fold the mean normalization into the mask and pre-shape it [4B,S,1] so
    # the kernel does neither the divide nor a lane->sublane relayout.
    # NOTE: an all-zero mask row divides by zero here (same as the torch ref);
    # callers must guarantee >= 1 valid token per row.
    counts = jnp.sum(masks, axis=1, keepdims=True)                     # [4B,1]
    smask = (masks / counts)[:, :, None]                               # [4B,S,1]
    ids3 = ids[:, :, None]                                             # [4B,S,1]

    # Split concat-weights in the wrapper so the kernel never concatenates on
    # the lane axis.
    We, Wa = W_t[:H], W_t[H:]                                          # [H,H] each
    CeT, CmT = C_t[:H].T, C_t[H:].T                                    # [2,H] each
    cb = C_b.reshape(2).astype(jnp.float32)                            # [2]

    vmem = lambda: pl.BlockSpec(memory_space=pltpu.MemorySpace.VMEM)
    smem = lambda: pl.BlockSpec(memory_space=pltpu.MemorySpace.SMEM)

    loss, preds = pl.pallas_call(
        _subsumption_kernel,
        out_shape=(jax.ShapeDtypeStruct((1, 1), jnp.float32),
                   jax.ShapeDtypeStruct((1, B), jnp.int32)),
        in_specs=[vmem(),   # ids
                  vmem(),   # scaled masks
                  vmem(),   # embedding table
                  vmem(),   # We
                  vmem(),   # Wa
                  vmem(),   # Wb
                  vmem(),   # CeT
                  vmem(),   # CmT
                  smem(),   # classifier bias (scalars)
                  vmem()],  # labels
        out_specs=(vmem(), vmem()),
    )(ids3, smask, embed_table, We, Wa, W_b, CeT, CmT, cb, labels)
    return loss[0, 0], preds[0, :], labels[:, 0]


def _reference(embed_table, ids1, mask1, ids2, mask2, aids1, amask1, aids2, amask2,
               W_t, W_b, C_t, C_b, labels):
    """Faithful recreation of the torch forward (eval mode) in plain JAX."""
    def get_emb(ids, m):
        e = embed_table[ids]
        return jnp.sum(e * m[:, :, None], axis=1) / jnp.sum(m, axis=1, keepdims=True)
    e1, e2 = get_emb(ids1, mask1), get_emb(ids2, mask2)
    a1, a2 = get_emb(aids1, amask1), get_emb(aids2, amask2)
    w1 = jax.nn.sigmoid(jnp.concatenate([e1, a1], -1) @ W_t + W_b)
    w2 = jax.nn.sigmoid(jnp.concatenate([e2, a2], -1) @ W_t + W_b)
    m1 = e1 + (w1 * e1 + (1 - w1) * a1)
    m2 = e2 + (w2 * e2 + (1 - w2) * a2)
    logits = jnp.concatenate([m1, m2], -1) @ C_t + C_b
    lse = jax.scipy.special.logsumexp(logits, axis=-1)
    picked = jnp.take_along_axis(logits, labels, axis=-1)[:, 0]
    return jnp.mean(lse - picked), jnp.argmax(logits, -1).astype(jnp.int32)


if __name__ == "__main__":
    key = jax.random.PRNGKey(0)
    ks = jax.random.split(key, 16)

    B, S, H, VOCAB = 8, 8, 32, 64

    # deterministic synthetic "checkpoint"
    embed_table = jax.random.normal(ks[0], (VOCAB, H), jnp.float32) * 0.5
    W_t = jax.random.normal(ks[1], (2 * H, H), jnp.float32) * 0.1   # Linear(2H->H), transposed
    W_b = jax.random.normal(ks[2], (1, H), jnp.float32) * 0.1
    C_t = jax.random.normal(ks[3], (2 * H, 2), jnp.float32) * 0.1   # Linear(2H->2), transposed
    C_b = jax.random.normal(ks[4], (1, 2), jnp.float32) * 0.1

    def make_seq(k):
        k1, k2 = jax.random.split(k)
        ids = jax.random.randint(k1, (B, S), 0, VOCAB)
        lengths = jax.random.randint(k2, (B,), 1, S + 1)   # >= 1 token per row
        mask = (jnp.arange(S)[None, :] < lengths[:, None]).astype(jnp.float32)
        return ids, mask

    ids1, mask1 = make_seq(ks[5])
    ids2, mask2 = make_seq(ks[6])
    aids1, amask1 = make_seq(ks[7])
    aids2, amask2 = make_seq(ks[8])
    labels = jax.random.randint(ks[9], (B, 1), 0, 2).astype(jnp.int32)

    loss, preds, label_ids = subsumption_forward(
        ids1, mask1, ids2, mask2, aids1, amask1, aids2, amask2,
        embed_table, W_t, W_b, C_t, C_b, labels)
    jax.block_until_ready((loss, preds, label_ids))

    ref_loss, ref_preds = _reference(
        embed_table, ids1, mask1, ids2, mask2, aids1, amask1, aids2, amask2,
        W_t, W_b, C_t, C_b, labels)

    # Slightly relaxed vs. a bit-exact check: the kernel folds 1/num_tokens into
    # the mask, folds the fusion algebra and pools via an MXU matmul, all of
    # which reorder f32 summations relative to the torch-style reference.
    assert jnp.allclose(loss, ref_loss, rtol=2e-4, atol=2e-5), (loss, ref_loss)
    assert jnp.array_equal(preds, ref_preds), (preds, ref_preds)
    assert jnp.array_equal(label_ids, labels[:, 0])

    print("KERNEL_OK")
</pallas_src>

<mosaic_0001>
module attributes {stable_mosaic.version = 11 : i64} {
  func.func @_subsumption_kernel(%arg0: memref<32x8x1xi32, #tpu.memory_space<vmem>>, %arg1: memref<32x8x1xf32, #tpu.memory_space<vmem>>, %arg2: memref<64x32xf32, #tpu.memory_space<vmem>>, %arg3: memref<32x32xf32, #tpu.memory_space<vmem>>, %arg4: memref<32x32xf32, #tpu.memory_space<vmem>>, %arg5: memref<1x32xf32, #tpu.memory_space<vmem>>, %arg6: memref<2x32xf32, #tpu.memory_space<vmem>>, %arg7: memref<2x32xf32, #tpu.memory_space<vmem>>, %arg8: memref<2xf32, #tpu.memory_space<smem>>, %arg9: memref<8x1xi32, #tpu.memory_space<vmem>>, %arg10: memref<1x1xf32, #tpu.memory_space<vmem>>, %arg11: memref<1x8xi32, #tpu.memory_space<vmem>>) attributes {dimension_semantics = [], scalar_prefetch = 0 : i64, scratch_operands = 0 : i64, tpu.core_type = #tpu.core_type<tc>} {
    %0 = tpu.iota {dimensions = array<i32: 2>} : vector<32x8x64xi32>
    %c0 = arith.constant 0 : index
    %c0_0 = arith.constant 0 : index
    %c0_1 = arith.constant 0 : index
    %1 = vector.load %arg0[%c0, %c0_0, %c0_1] : memref<32x8x1xi32, #tpu.memory_space<vmem>>, vector<32x8x1xi32>
    %2 = vector.broadcast %1 : vector<32x8x1xi32> to vector<32x8x64xi32>
    %3 = arith.cmpi eq, %2, %0 : vector<32x8x64xi32>
    %4 = arith.extui %3 : vector<32x8x64xi1> to vector<32x8x64xi32>
    %5 = arith.sitofp %4 : vector<32x8x64xi32> to vector<32x8x64xf32>
    %c0_2 = arith.constant 0 : index
    %c0_3 = arith.constant 0 : index
    %c0_4 = arith.constant 0 : index
    %6 = vector.load %arg1[%c0_2, %c0_3, %c0_4] : memref<32x8x1xf32, #tpu.memory_space<vmem>>, vector<32x8x1xf32>
    %7 = vector.broadcast %6 : vector<32x8x1xf32> to vector<32x8x64xf32>
    %8 = arith.mulf %7, %5 : vector<32x8x64xf32>
    %cst = arith.constant dense<0.000000e+00> : vector<32x64xf32>
    %9 = vector.multi_reduction <add>, %8, %cst [1] : vector<32x8x64xf32> to vector<32x64xf32>
    %c0_5 = arith.constant 0 : index
    %c0_6 = arith.constant 0 : index
    %10 = vector.load %arg2[%c0_5, %c0_6] : memref<64x32xf32, #tpu.memory_space<vmem>>, vector<64x32xf32>
    %cst_7 = arith.constant dense<0.000000e+00> : vector<32x32xf32>
    %11 = tpu.matmul %9, %10, %cst_7 {dimension_numbers = #tpu.dot_dimension_numbers<[1], [0], [0], [1], [0, 0, 1, 1], [], []>} : vector<32x64xf32>, vector<64x32xf32>, vector<32x32xf32> -> vector<32x32xf32>
    %12 = vector.extract_strided_slice %11 {offsets = [0, 0], sizes = [16, 32], strides = [1, 1]} : vector<32x32xf32> to vector<16x32xf32>
    %13 = vector.extract_strided_slice %11 {offsets = [16, 0], sizes = [16, 32], strides = [1, 1]} : vector<32x32xf32> to vector<16x32xf32>
    %c0_8 = arith.constant 0 : index
    %c0_9 = arith.constant 0 : index
    %14 = vector.load %arg3[%c0_8, %c0_9] : memref<32x32xf32, #tpu.memory_space<vmem>>, vector<32x32xf32>
    %cst_10 = arith.constant dense<0.000000e+00> : vector<16x32xf32>
    %15 = tpu.matmul %12, %14, %cst_10 {dimension_numbers = #tpu.dot_dimension_numbers<[1], [0], [0], [1], [0, 0, 1, 1], [], []>} : vector<16x32xf32>, vector<32x32xf32>, vector<16x32xf32> -> vector<16x32xf32>
    %c0_11 = arith.constant 0 : index
    %c0_12 = arith.constant 0 : index
    %16 = vector.load %arg4[%c0_11, %c0_12] : memref<32x32xf32, #tpu.memory_space<vmem>>, vector<32x32xf32>
    %cst_13 = arith.constant dense<0.000000e+00> : vector<16x32xf32>
    %17 = tpu.matmul %13, %16, %cst_13 {dimension_numbers = #tpu.dot_dimension_numbers<[1], [0], [0], [1], [0, 0, 1, 1], [], []>} : vector<16x32xf32>, vector<32x32xf32>, vector<16x32xf32> -> vector<16x32xf32>
    %18 = arith.addf %15, %17 : vector<16x32xf32>
    %c0_14 = arith.constant 0 : index
    %c0_15 = arith.constant 0 : index
    %19 = vector.load %arg5[%c0_14, %c0_15] : memref<1x32xf32, #tpu.memory_space<vmem>>, vector<1x32xf32>
    %20 = vector.broadcast %19 : vector<1x32xf32> to vector<16x32xf32>
    %21 = arith.addf %18, %20 : vector<16x32xf32>
    %22 = arith.negf %21 : vector<16x32xf32>
    %23 = math.exp %22 : vector<16x32xf32>
    %cst_16 = arith.constant 1.000000e+00 : f32
    %24 = vector.broadcast %cst_16 : f32 to vector<16x32xf32>
    %25 = arith.addf %24, %23 : vector<16x32xf32>
    %26 = arith.divf %24, %25 : vector<16x32xf32>
    %27 = arith.addf %12, %13 : vector<16x32xf32>
    %28 = arith.subf %12, %13 : vector<16x32xf32>
    %29 = arith.mulf %26, %28 : vector<16x32xf32>
    %30 = arith.addf %27, %29 : vector<16x32xf32>
    %31 = vector.extract_strided_slice %30 {offsets = [0, 0], sizes = [8, 32], strides = [1, 1]} : vector<16x32xf32> to vector<8x32xf32>
    %32 = vector.extract_strided_slice %30 {offsets = [8, 0], sizes = [8, 32], strides = [1, 1]} : vector<16x32xf32> to vector<8x32xf32>
    %c0_17 = arith.constant 0 : index
    %c0_18 = arith.constant 0 : index
    %33 = vector.load %arg6[%c0_17, %c0_18] : memref<2x32xf32, #tpu.memory_space<vmem>>, vector<1x32xf32>
    %34 = vector.broadcast %33 : vector<1x32xf32> to vector<8x32xf32>
    %35 = arith.mulf %31, %34 : vector<8x32xf32>
    %c0_19 = arith.constant 0 : index
    %c0_20 = arith.constant 0 : index
    %36 = vector.load %arg7[%c0_19, %c0_20] : memref<2x32xf32, #tpu.memory_space<vmem>>, vector<1x32xf32>
    %37 = vector.broadcast %36 : vector<1x32xf32> to vector<8x32xf32>
    %38 = arith.mulf %32, %37 : vector<8x32xf32>
    %39 = arith.addf %35, %38 : vector<8x32xf32>
    %cst_21 = arith.constant dense<0.000000e+00> : vector<8xf32>
    %40 = vector.multi_reduction <add>, %39, %cst_21 [1] : vector<8x32xf32> to vector<8xf32>
    %41 = vector.shape_cast %40 : vector<8xf32> to vector<8x1xf32>
    %c0_22 = arith.constant 0 : index
    %42 = memref.load %arg8[%c0_22] : memref<2xf32, #tpu.memory_space<smem>>
    %43 = vector.broadcast %42 : f32 to vector<8x1xf32>
    %44 = arith.addf %41, %43 : vector<8x1xf32>
    %c1 = arith.constant 1 : index
    %c0_23 = arith.constant 0 : index
    %45 = vector.load %arg6[%c1, %c0_23] : memref<2x32xf32, #tpu.memory_space<vmem>>, vector<1x32xf32>
    %46 = vector.broadcast %45 : vector<1x32xf32> to vector<8x32xf32>
    %47 = arith.mulf %31, %46 : vector<8x32xf32>
    %c1_24 = arith.constant 1 : index
    %c0_25 = arith.constant 0 : index
    %48 = vector.load %arg7[%c1_24, %c0_25] : memref<2x32xf32, #tpu.memory_space<vmem>>, vector<1x32xf32>
    %49 = vector.broadcast %48 : vector<1x32xf32> to vector<8x32xf32>
    %50 = arith.mulf %32, %49 : vector<8x32xf32>
    %51 = arith.addf %47, %50 : vector<8x32xf32>
    %cst_26 = arith.constant dense<0.000000e+00> : vector<8xf32>
    %52 = vector.multi_reduction <add>, %51, %cst_26 [1] : vector<8x32xf32> to vector<8xf32>
    %53 = vector.shape_cast %52 : vector<8xf32> to vector<8x1xf32>
    %c1_27 = arith.constant 1 : index
    %54 = memref.load %arg8[%c1_27] : memref<2xf32, #tpu.memory_space<smem>>
    %55 = vector.broadcast %54 : f32 to vector<8x1xf32>
    %56 = arith.addf %53, %55 : vector<8x1xf32>
    %57 = arith.maximumf %44, %56 : vector<8x1xf32>
    %58 = arith.subf %44, %57 : vector<8x1xf32>
    %59 = math.exp %58 : vector<8x1xf32>
    %60 = arith.subf %56, %57 : vector<8x1xf32>
    %61 = math.exp %60 : vector<8x1xf32>
    %62 = arith.addf %59, %61 : vector<8x1xf32>
    %63 = math.log %62 : vector<8x1xf32>
    %64 = arith.addf %57, %63 : vector<8x1xf32>
    %c0_28 = arith.constant 0 : index
    %c0_29 = arith.constant 0 : index
    %65 = vector.load %arg9[%c0_28, %c0_29] : memref<8x1xi32, #tpu.memory_space<vmem>>, vector<8x1xi32>
    %c1_i32 = arith.constant 1 : i32
    %66 = vector.broadcast %c1_i32 : i32 to vector<8x1xi32>
    %67 = arith.cmpi eq, %65, %66 : vector<8x1xi32>
    %68 = arith.select %67, %56, %44 : vector<8x1xi1>, vector<8x1xf32>
    %69 = arith.subf %64, %68 : vector<8x1xf32>
    %70 = vector.shape_cast %69 : vector<8x1xf32> to vector<1x8x1xf32>
    %cst_30 = arith.constant dense<0.000000e+00> : vector<1xf32>
    %71 = vector.multi_reduction <add>, %70, %cst_30 [1, 2] : vector<1x8x1xf32> to vector<1xf32>
    %72 = vector.shape_cast %71 : vector<1xf32> to vector<1x1x1xf32>
    %73 = vector.extract %72[0, 0, 0] : f32 from vector<1x1x1xf32>
    %cst_31 = arith.constant 8.000000e+00 : f32
    %74 = arith.divf %73, %cst_31 : f32
    %75 = vector.broadcast %74 : f32 to vector<1x1xf32>
    %c0_32 = arith.constant 0 : index
    %c0_33 = arith.constant 0 : index
    %76 = vector.load %arg10[%c0_32, %c0_33] : memref<1x1xf32, #tpu.memory_space<vmem>>, vector<1x1xf32>
    tpu.vector_store %arg10[%c0_32, %c0_33], %75 {strides = array<i32>} : memref<1x1xf32, #tpu.memory_space<vmem>>, vector<1x1xf32>,
    %77 = arith.cmpf ogt, %56, %44 : vector<8x1xf32>
    %78 = arith.extui %77 : vector<8x1xi1> to vector<8x1xi32>
    %79 = arith.sitofp %78 : vector<8x1xi32> to vector<8x1xf32>
    %80 = tpu.iota {dimensions = array<i32: 0>} : vector<8x8xi32>
    %81 = tpu.iota {dimensions = array<i32: 1>} : vector<8x8xi32>
    %82 = arith.cmpi eq, %80, %81 : vector<8x8xi32>
    %83 = arith.extui %82 : vector<8x8xi1> to vector<8x8xi32>
    %84 = arith.sitofp %83 : vector<8x8xi32> to vector<8x8xf32>
    %85 = vector.broadcast %79 : vector<8x1xf32> to vector<8x8xf32>
    %86 = arith.mulf %85, %84 : vector<8x8xf32>
    %cst_34 = arith.constant dense<0.000000e+00> : vector<8xf32>
    %87 = vector.multi_reduction <add>, %86, %cst_34 [0] : vector<8x8xf32> to vector<8xf32>
    %88 = vector.shape_cast %87 : vector<8xf32> to vector<1x8xf32>
    %89 = arith.fptosi %88 : vector<1x8xf32> to vector<1x8xi32>
    %c0_35 = arith.constant 0 : index
    %c0_36 = arith.constant 0 : index
    %90 = vector.load %arg11[%c0_35, %c0_36] : memref<1x8xi32, #tpu.memory_space<vmem>>, vector<1x8xi32>
    tpu.vector_store %arg11[%c0_35, %c0_36], %89 {strides = array<i32>} : memref<1x8xi32, #tpu.memory_space<vmem>>, vector<1x8xi32>,
    return
  }
}

</mosaic_0001>

<bundles_post_ra>
// kernel: tpu_custom_call.1
= control target key start
LH: loop header
LB: loop body
LE: loop exit
PB: predicated region body
PF: predicated region fallthrough
CT: control target
= control target key end

     0   :  { %17 = vsyncpa [#allocation4], 0  ;;  %s1785_s0 = inlined_call_operand.vmem [shape: s32[32,8,1], index: 0, kind: input, shape index: {}]   ;;  %s1786_s1 = inlined_call_operand.vmem [shape: f32[32,8,1], index: 1, kind: input, shape index: {}]   ;;  %s1787_s2 = inlined_call_operand.vmem [shape: f32[64,32], index: 2, kind: input, shape index: {}]   ;;  %s1788_s3 = inlined_call_operand.vmem [shape: f32[32,32], index: 3, kind: input, shape index: {}]   ;;  %s1789_s4 = inlined_call_operand.vmem [shape: f32[32,32], index: 4, kind: input, shape index: {}]   ;;  %s1790_s5 = inlined_call_operand.vmem [shape: f32[1,32], index: 5, kind: input, shape index: {}]   ;;  %s1791_s6 = inlined_call_operand.vmem [shape: f32[2,32], index: 6, kind: input, shape index: {}]   ;;  %s1792_s7 = inlined_call_operand.vmem [shape: f32[2,32], index: 7, kind: input, shape index: {}]   ;;  %s1793_s8 = inlined_call_operand.vmem [shape: f32[2], index: 8, kind: input, shape index: {}]   ;;  %s1794_s9 = inlined_call_operand.vmem [shape: s32[8,1], index: 9, kind: input, shape index: {}]   ;;  %s1795_s10 = inlined_call_operand.hbm [shape: f32[1,1], index: 10, kind: output, shape index: {0}]   ;;  %s1796_s11 = inlined_call_operand.hbm [shape: s32[1,8], index: 11, kind: output, shape index: {1}]  }
   0x1   :  { %18 = vsyncpa [#allocation3], 0 }
   0x2   :  { %19 = vsyncpa [#allocation7], 0  ;;  %s41_s19 = sshll.u32 %s1793_s8, 4  ;;  %s1233_s20 = smov [#allocation2]   ;;  %s42_s19 = int_to_ptr.vmem [resolvable:$true] %s41_s19 }
   0x3   :  { %44 = dma.vmem_to_smem %s42_s19, 16, %s1233_s20, [#allocation4]  }
   0x4   :  { %1227 = dma.done.wait [#allocation4], 16  }
   0x5   :  { %1228 = vsyncadd [#allocation4], 4294967280 }
   0x6   :  { %51 = sfence }
   0x7   :  { %v70_v0 = vld [vmem:[%s1785_s0 + $0x80] sm:$0xff]  ;;  %v56_v1 = vld [vmem:[%s1785_s0 + $0x10] sm:$0xff]  ;;  %v1234_v3 = vmov 0   ;;  %v71_v4 = vld [vmem:[%s1785_s0 + $0x88] sm:$0xff]  ;;  %v52_v46 = vlaneseq  ;;  %v1235_v54 = vmov 0.0   ;;  %vm502_vm2 = vcmask 523264  }
   0x8   :  { %v54_v2 = vld [vmem:[%s1785_s0] sm:$0xff]  ;;  %1145 = vset.pattern.permute.xlu2 %v1234_v3  ;;  %1144 = vset.pattern.permute.xlu1 %v1234_v3  ;;  %v72_v5 = vld [vmem:[%s1785_s0 + $0x90] sm:$0xff]  ;;  %v55_v6 = vld [vmem:[%s1785_s0 + $0x8] sm:$0xff]  ;;  %vm767_vm7 = vcmask 1041409   ;;  %vm769_vm8 = vcmask 1042434   ;;  %vm771_vm13 = vcmask 1043459  }
   0x9   :  { %1143 = vset.pattern.permute.xlu0 %v1234_v3  ;;  %135 = vperm.xlu1 %1144, %v70_v0   ;;  %v73_v7 = vld [vmem:[%s1785_s0 + $0x98] sm:$0xff]  ;;  %v278_v8 = vld [vmem:[%s1786_s1] sm:$0xff]  ;;  %v295_v11 = vld [vmem:[%s1786_s1 + $0x88] sm:$0xff]  ;;  %v1440_v50 = vand.u32 127, %v52_v46  ;;  %s968_s22 = sld [smem:[#allocation2]]  ;;  %s1236_s23 = smov [#allocation6]  }
   0xa   :  { %93 = vperm.xlu2 %1145, %v56_v1   ;;  %87 = vperm.xlu0 %1143, %v54_v2   ;;  %v57_v9 = vld [vmem:[%s1785_s0 + $0x18] sm:$0xff]  ;;  %v294_v10 = vld [vmem:[%s1786_s1 + $0x80] sm:$0xff]  ;;  %v279_v12 = vld [vmem:[%s1786_s1 + $0x8] sm:$0xff]  ;;  %s1058_s24 = sshll.u32 %s1236_s23, 4  ;;  %s1060_s8 = sshll.u32 %s1796_s11, 4  ;;  %s1059_s24 = int_to_ptr.vmem [resolvable:$true] %s1058_s24  ;;  %s1061_s8 = int_to_ptr.hbm [resolvable:$true] %s1060_s8 }
   0xb   :  { %v74_v13 = vld [vmem:[%s1785_s0 + $0xa0] sm:$0xff]  ;;  %v280_v14 = vld [vmem:[%s1786_s1 + $0x10] sm:$0xff]  ;;  %v59_v16 = vld [vmem:[%s1785_s0 + $0x28] sm:$0xff]  ;;  %s1049_s30 = sshll.u32 %s1795_s10, 4  ;;  %s1050_s30 = int_to_ptr.hbm [resolvable:$true] %s1049_s30 }
   0xc   :  { %v58_v15 = vld [vmem:[%s1785_s0 + $0x20] sm:$0xff]  ;;  %v75_v17 = vld [vmem:[%s1785_s0 + $0xa8] sm:$0xff]  ;;  %v296_v18 = vld [vmem:[%s1786_s1 + $0x90] sm:$0xff] }
   0xd   :  { %v297_v19 = vld [vmem:[%s1786_s1 + $0x98] sm:$0xff]  ;;  %v60_v20 = vld [vmem:[%s1785_s0 + $0x30] sm:$0xff]  ;;  %v282_v22 = vld [vmem:[%s1786_s1 + $0x20] sm:$0xff] }
   0xe   :  { %v281_v21 = vld [vmem:[%s1786_s1 + $0x18] sm:$0xff]  ;;  %v298_v23 = vld [vmem:[%s1786_s1 + $0xa0] sm:$0xff]  ;;  %v76_v24 = vld [vmem:[%s1785_s0 + $0xb0] sm:$0xff] }
   0xf   :  { %v77_v25 = vld [vmem:[%s1785_s0 + $0xb8] sm:$0xff]  ;;  %v283_v26 = vld [vmem:[%s1786_s1 + $0x28] sm:$0xff]  ;;  %v284_v28 = vld [vmem:[%s1786_s1 + $0x30] sm:$0xff] }
  0x10   :  { %v61_v27 = vld [vmem:[%s1785_s0 + $0x38] sm:$0xff]  ;;  %v300_v29 = vld [vmem:[%s1786_s1 + $0xb0] sm:$0xff]  ;;  %v299_v30 = vld [vmem:[%s1786_s1 + $0xa8] sm:$0xff] }
  0x11   :  { %138 = vperm.xlu1 %1144, %v71_v4   ;;  %v63_v31 = vld [vmem:[%s1785_s0 + $0x48] sm:$0xff]  ;;  %v78_v32 = vld [vmem:[%s1785_s0 + $0xc0] sm:$0xff]  ;;  %v285_v34 = vld [vmem:[%s1786_s1 + $0x38] sm:$0xff] }
  0x12   :  { %141 = vperm.xlu2 %1145, %v72_v5   ;;  %90 = vperm.xlu0 %1143, %v55_v6   ;;  %v62_v33 = vld [vmem:[%s1785_s0 + $0x40] sm:$0xff]  ;;  %v301_v35 = vld [vmem:[%s1786_s1 + $0xb8] sm:$0xff]  ;;  %v79_v36 = vld [vmem:[%s1785_s0 + $0xc8] sm:$0xff] }
  0x13   :  { %v80_v38 = vld [vmem:[%s1785_s0 + $0xd0] sm:$0xff]  ;;  %v65_v39 = vld [vmem:[%s1785_s0 + $0x58] sm:$0xff]  ;;  %v286_v42 = vld [vmem:[%s1786_s1 + $0x40] sm:$0xff] }
  0x14   :  { %v64_v40 = vld [vmem:[%s1785_s0 + $0x50] sm:$0xff]  ;;  %v287_v43 = vld [vmem:[%s1786_s1 + $0x48] sm:$0xff]  ;;  %v81_v44 = vld [vmem:[%s1785_s0 + $0xd8] sm:$0xff] }
  0x15   :  { %v303_v47 = vld [vmem:[%s1786_s1 + $0xc8] sm:$0xff]  ;;  %v66_v48 = vld [vmem:[%s1785_s0 + $0x60] sm:$0xff]  ;;  %v288_v56 = vld [vmem:[%s1786_s1 + $0x50] sm:$0xff] }
  0x16   :  { %v302_v49 = vld [vmem:[%s1786_s1 + $0xc0] sm:$0xff]  ;;  %v304_v58 = vld [vmem:[%s1786_s1 + $0xd0] sm:$0xff]  ;;  %v83_v1 = vld [vmem:[%s1785_s0 + $0xe8] sm:$0xff] }
  0x17   :  { %v82_v59 = vld [vmem:[%s1785_s0 + $0xe0] sm:$0xff]  ;;  %v289_v2 = vld [vmem:[%s1786_s1 + $0x58] sm:$0xff]  ;;  %v67_v3 = vld [vmem:[%s1785_s0 + $0x68] sm:$0xff] }
  0x19   :  { %144 = vperm.xlu1 %1144, %v73_v7  }
  0x1a   :  { %312 = vperm.xlu2 %1145, %v278_v8   ;;  %96 = vperm.xlu0 %1143, %v57_v9  }
  0x21   :  { %392 = vperm.xlu1 %1144, %v294_v10   ;;  %v68_v10 = vld [vmem:[%s1785_s0 + $0x70] sm:$0xff] }
  0x22   :  { %397 = vperm.xlu2 %1145, %v295_v11   ;;  %317 = vperm.xlu0 %1143, %v279_v12   ;;  %v84_v12 = vld [vmem:[%s1785_s0 + $0xf0] sm:$0xff] }
  0x29   :  { %147 = vperm.xlu1 %1144, %v74_v13   ;;  %v305_v13 = vld [vmem:[%s1786_s1 + $0xd8] sm:$0xff] }
  0x2a   :  { %322 = vperm.xlu2 %1145, %v280_v14   ;;  %99 = vperm.xlu0 %1143, %v58_v15  }
  0x31   :  { %102 = vperm.xlu1 %1144, %v59_v16  }
  0x32   :  { %150 = vperm.xlu2 %1145, %v75_v17   ;;  %402 = vperm.xlu0 %1143, %v296_v18  }
  0x39   :  { %407 = vperm.xlu1 %1144, %v297_v19  }
  0x3a   :  { %105 = vperm.xlu2 %1145, %v60_v20   ;;  %327 = vperm.xlu0 %1143, %v281_v21  }
  0x41   :  { %332 = vperm.xlu1 %1144, %v282_v22  }
  0x42   :  { %412 = vperm.xlu2 %1145, %v298_v23   ;;  %153 = vperm.xlu0 %1143, %v76_v24  }
  0x49   :  { %156 = vperm.xlu1 %1144, %v77_v25  }
  0x4a   :  { %337 = vperm.xlu2 %1145, %v283_v26   ;;  %108 = vperm.xlu0 %1143, %v61_v27   ;;  %v306_v26 = vld [vmem:[%s1786_s1 + $0xe0] sm:$0xff] }
  0x51   :  { %342 = vperm.xlu1 %1144, %v284_v28  }
  0x52   :  { %422 = vperm.xlu2 %1145, %v300_v29   ;;  %417 = vperm.xlu0 %1143, %v299_v30   ;;  %v69_v29 = vld [vmem:[%s1785_s0 + $0x78] sm:$0xff]  ;;  %v290_v30 = vld [vmem:[%s1786_s1 + $0x60] sm:$0xff] }
  0x59   :  { %114 = vperm.xlu1 %1144, %v63_v31  }
  0x5a   :  { %159 = vperm.xlu2 %1145, %v78_v32   ;;  %111 = vperm.xlu0 %1143, %v62_v33  }
  0x61   :  { %347 = vperm.xlu1 %1144, %v285_v34  }
  0x62   :  { %427 = vperm.xlu2 %1145, %v301_v35   ;;  %162 = vperm.xlu0 %1143, %v79_v36  }
  0x64   :  { %v94_v37 = vpop.permute.xlu2 %93 }
  0x65   :  { %vm184_vm1 = vcmp.eq.s32.totalorder %v94_v37, %v1440_v50 }
  0x66   :  { %v1077_v60 = vsel %vm184_vm1, 1.0, %v1235_v54 }
  0x69   :  { %165 = vperm.xlu1 %1144, %v80_v38  }
  0x6a   :  { %120 = vperm.xlu2 %1145, %v65_v39   ;;  %117 = vperm.xlu0 %1143, %v64_v40  }
  0x6c   :  { %v1419_v41 = vpop.permute.xlu2 %141 }
  0x6d   :  { %vm200_vm6 = vcmp.eq.s32.totalorder %v1419_v41, %v1440_v50 }
  0x71   :  { %352 = vperm.xlu1 %1144, %v286_v42  }
  0x72   :  { %357 = vperm.xlu2 %1145, %v287_v43   ;;  %168 = vperm.xlu0 %1143, %v81_v44  }
  0x74   :  { %v313_v45 = vpop.permute.xlu2 %312 }
  0x79   :  { %437 = vperm.xlu1 %1144, %v303_v47   ;;  %v291_v47 = vld [vmem:[%s1786_s1 + $0x68] sm:$0xff] }
  0x7a   :  { %123 = vperm.xlu2 %1145, %v66_v48   ;;  %432 = vperm.xlu0 %1143, %v302_v49  }
  0x7b   :  { %v136_v51 = vpop.permute.xlu1 %135 }
  0x7c   :  { %v398_v52 = vpop.permute.xlu2 %397  ;;  %v88_v53 = vpop.permute.xlu0 %87  ;;  %vm198_vm3 = vcmp.eq.s32.totalorder %v136_v51, %v1440_v50  ;;  %v307_v51 = vld [vmem:[%s1786_s1 + $0xe8] sm:$0xff] }
  0x7d   :  { %vm182_vm0 = vcmp.eq.s32.totalorder %v88_v53, %v1440_v50  ;;  %v1091_v18 = vsel %vm198_vm3, 1.0, %v1235_v54 }
  0x7e   :  { %v1075_v55 = vsel %vm182_vm0, 1.0, %v1235_v54 }
  0x7f   :  { %v470_v57 = vmul.f32 %v1075_v55, %v313_v45 }
  0x81   :  { %362 = vperm.xlu1 %1144, %v288_v56   ;;  %v503_v4 = vsel %vm502_vm2, %v470_v57, 0.0 }
  0x82   :  { %442 = vperm.xlu2 %1145, %v304_v58   ;;  %171 = vperm.xlu0 %1143, %v82_v59   ;;  %v504_v9 = vrot.slane %v503_v4, 4 }
  0x83   :  { %v139_v61 = vpop.permute.xlu1 %138 }
  0x84   :  { %v323_v62 = vpop.permute.xlu2 %322  ;;  %v91_v63 = vpop.permute.xlu0 %90  ;;  %vm199_vm4 = vcmp.eq.s32.totalorder %v139_v61, %v1440_v50  ;;  %v505_v14 = vadd.f32 %v504_v9, %v503_v4  ;;  %v293_v9 = vld [vmem:[%s1786_s1 + $0x78] sm:$0xff] }
  0x85   :  { %v472_v0 = vmul.f32 %v1077_v60, %v323_v62  ;;  %vm183_vm5 = vcmp.eq.s32.totalorder %v91_v63, %v1440_v50  ;;  %v1092_v15 = vsel %vm199_vm4, 1.0, %v1235_v54  ;;  %vm773_vm4 = vcmask 1044484  }
  0x86   :  { %v1076_v22 = vsel %vm183_vm5, 1.0, %v1235_v54  ;;  %v506_v24 = vrot.slane %v505_v14, 2  ;;  %v487_v25 = vmul.f32 %v1092_v15, %v398_v52  ;;  %v85_v52 = vld [vmem:[%s1785_s0 + $0xf8] sm:$0xff] }
  0x87   :  { %v517_v6 = vsel %vm502_vm2, %v472_v0, 0.0  ;;  %v1093_v0 = vsel %vm200_vm6, 1.0, %v1235_v54 }
  0x88   :  { %v518_v11 = vrot.slane %v517_v6, 4  ;;  %v507_v33 = vadd.f32 %v506_v24, %v505_v14  ;;  %v622_v34 = vsel %vm502_vm2, %v487_v25, 0.0  ;;  %v733_v14 = vld [vmem:[%s1787_s2 + $0x30] sm:$0xff]  ;;  %v731_v25 = vld [vmem:[%s1787_s2 + $0x20] sm:$0xff] }
  0x89   :  { %174 = vperm.xlu1 %1144, %v83_v1   ;;  %v623_v43 = vrot.slane %v622_v34, 4 }
  0x8a   :  { %367 = vperm.xlu2 %1145, %v289_v2   ;;  %126 = vperm.xlu0 %1143, %v67_v3   ;;  %v519_v16 = vadd.f32 %v518_v11, %v517_v6  ;;  %v508_v44 = vrot.slane %v507_v33, 1  ;;  %v308_v3 = vld [vmem:[%s1786_s1 + $0xf0] sm:$0xff]  ;;  %v734_v11 = vld [vmem:[%s1787_s2 + $0x38] sm:$0xff] }
  0x8b   :  { %v1465_v5 = vpop.permute.xlu1 %144  ;;  %v624_v55 = vadd.f32 %v623_v43, %v622_v34  ;;  %1120 = vmatpush.msra.mxu3 %v734_v11  ;;  %818 = vmatpush.msra.mxu0 %v734_v11 }
  0x8c   :  { %v1468_v7 = vpop.permute.xlu2 %150  ;;  %v1470_v8 = vpop.permute.xlu0 %96  ;;  %v520_v27 = vrot.slane %v519_v16, 2  ;;  %v509_v56 = vadd.f32 %v508_v44, %v507_v33  ;;  %vm201_vm10 = vcmp.eq.s32.totalorder %v1465_v5, %v1440_v50  ;;  %v309_v5 = vld [vmem:[%s1786_s1 + $0xf8] sm:$0xff] }
  0x8d   :  { %v625_v41 = vrot.slane %v624_v55, 2  ;;  %vm185_vm9 = vcmp.eq.s32.totalorder %v1470_v8, %v1440_v50  ;;  %1121 = vmatpush.msra.mxu3 %v733_v14  ;;  %819 = vmatpush.msra.mxu0 %v733_v14  ;;  %vm203_vm3 = vcmp.eq.s32.totalorder %v1468_v7, %v1440_v50 }
  0x8e   :  { %v521_v36 = vadd.f32 %v520_v27, %v519_v16 }
  0x90   :  { %v522_v48 = vrot.slane %v521_v36, 1 }
  0x91   :  { %129 = vperm.xlu1 %1144, %v68_v10   ;;  %v292_v10 = vld [vmem:[%s1786_s1 + $0x70] sm:$0xff] }
  0x92   :  { %177 = vperm.xlu2 %1145, %v84_v12   ;;  %447 = vperm.xlu0 %1143, %v305_v13   ;;  %v523_v58 = vadd.f32 %v522_v48, %v521_v36  ;;  %v626_v13 = vadd.f32 %v625_v41, %v624_v55 }
  0x93   :  { %v393_v17 = vpop.permute.xlu1 %392 }
  0x94   :  { %v486_v19 = vmul.f32 %v1091_v18, %v393_v17  ;;  %v1486_v20 = vpop.permute.xlu2 %105  ;;  %v318_v21 = vpop.permute.xlu0 %317  ;;  %v732_v18 = vld [vmem:[%s1787_s2 + $0x28] sm:$0xff] }
  0x95   :  { %v471_v23 = vmul.f32 %v1076_v22, %v318_v21  ;;  %v1078_v22 = vsel %vm185_vm9, 1.0, %v1235_v54  ;;  %1122 = vmatpush.msra.mxu3 %v732_v18  ;;  %820 = vmatpush.msra.mxu0 %v732_v18  ;;  %vm188_vm1 = vcmp.eq.s32.totalorder %v1486_v20, %v1440_v50  ;;  %vm775_vm9 = vcmask 1045509  }
  0x96   :  { %v615_v31 = vsel %vm502_vm2, %v486_v19, 0.0 }
  0x97   :  { %v510_v28 = vsel %vm502_vm2, %v471_v23, 0.0  ;;  %v616_v37 = vrot.slane %v615_v31, 4  ;;  %v627_v23 = vrot.slane %v626_v13, 1  ;;  %1123 = vmatpush.msra.mxu3 %v731_v25  ;;  %821 = vmatpush.msra.mxu0 %v731_v25  ;;  %v1096_v25 = vsel %vm203_vm3, 1.0, %v1235_v54 }
  0x98   :  { %v511_v32 = vrot.slane %v510_v28, 4 }
  0x99   :  { %452 = vperm.xlu1 %1144, %v306_v26   ;;  %v617_v49 = vadd.f32 %v616_v37, %v615_v31  ;;  %v628_v34 = vadd.f32 %v627_v23, %v626_v13 }
  0x9a   :  { %v512_v35 = vadd.f32 %v511_v32, %v510_v28  ;;  %132 = vperm.xlu2 %1145, %v69_v29   ;;  %372 = vperm.xlu0 %1143, %v290_v30   ;;  %v1094_v28 = vsel %vm201_vm10, 1.0, %v1235_v54  ;;  %v730_v30 = vld [vmem:[%s1787_s2 + $0x18] sm:$0xff]  ;;  %vm777_vm10 = vcmask 1046534  }
  0x9b   :  { %v1501_v38 = vpop.permute.xlu1 %147  ;;  %v618_v59 = vrot.slane %v617_v49, 2  ;;  %1124 = vmatpush.msra.mxu3 %v730_v30  ;;  %822 = vmatpush.msra.mxu0 %v730_v30 }
  0x9c   :  { %v513_v39 = vrot.slane %v512_v35, 2  ;;  %v1503_v40 = vpop.permute.xlu2 %412  ;;  %v1505_v42 = vpop.permute.xlu0 %99  ;;  %vm202_vm11 = vcmp.eq.s32.totalorder %v1501_v38, %v1440_v50  ;;  %v728_v38 = vld [vmem:[%s1787_s2 + $0x8] sm:$0xff] }
  0x9d   :  { %v619_v4 = vadd.f32 %v618_v59, %v617_v49  ;;  %v1095_v43 = vsel %vm202_vm11, 1.0, %v1235_v54  ;;  %vm186_vm14 = vcmp.eq.s32.totalorder %v1505_v42, %v1440_v50  ;;  %vm779_vm11 = vcmask 1047559  }
  0x9e   :  { %v514_v45 = vadd.f32 %v513_v39, %v512_v35  ;;  %v729_v35 = vld [vmem:[%s1787_s2 + $0x10] sm:$0xff]  ;;  %v1079_v42 = vsel %vm186_vm14, 1.0, %v1235_v54 }
  0x9f   :  { %v620_v16 = vrot.slane %v619_v4, 1  ;;  %1125 = vmatpush.msra.mxu3 %v729_v35  ;;  %823 = vmatpush.msra.mxu0 %v729_v35 }
  0xa0   :  { %v515_v53 = vrot.slane %v514_v45, 1 }
  0xa1   :  { %377 = vperm.xlu1 %1144, %v291_v47   ;;  %v621_v27 = vadd.f32 %v620_v16, %v619_v4  ;;  %1126 = vmatpush.msra.mxu3 %v728_v38 }
  0xa2   :  { %v516_v57 = vadd.f32 %v515_v53, %v514_v45  ;;  %457 = vperm.xlu2 %1145, %v307_v51   ;;  %180 = vperm.xlu0 %1143, %v85_v52   ;;  %v727_v52 = vld [vmem:[%s1787_s2] sm:$0xff]  ;;  %v490_v53 = vmul.f32 %v1095_v43, %v1503_v40  ;;  %s1117_s2 = sld [smem:[#allocation2 + $0x1]] }
  0xa3   :  { %v1518_v60 = vpop.permute.xlu1 %102  ;;  %v788_v39 = vsel %vm767_vm7, %v628_v34, %v621_v27  ;;  %824 = vmatpush.msra.mxu0 %v728_v38  ;;  %1127 = vmatpush.msra.mxu3 %v727_v52 }
  0xa4   :  { %v768_v61 = vsel %vm767_vm7, %v516_v57, %v509_v56  ;;  %v1521_v62 = vpop.permute.xlu2 %337  ;;  %v403_v63 = vpop.permute.xlu0 %402  ;;  %vm187_vm15 = vcmp.eq.s32.totalorder %v1518_v60, %v1440_v50 }
  0xa5   :  { %v488_v1 = vmul.f32 %v1093_v0, %v403_v63  ;;  %v1525_v2 = vsel %vm769_vm8, %v523_v58, %v768_v61  ;;  %825 = vmatpush.msra.mxu0 %v727_v52  ;;  %v643_v61 = vsel %vm502_vm2, %v490_v53, 0.0  ;;  %v1080_v60 = vsel %vm187_vm15, 1.0, %v1235_v54 }
  0xa6   :  { %v475_v16 = vmul.f32 %v1080_v60, %v1521_v62 }
  0xa7   :  { %v629_v6 = vsel %vm502_vm2, %v488_v1, 0.0 }
  0xa8   :  { %v630_v12 = vrot.slane %v629_v6, 4 }
  0xa9   :  { %462 = vperm.xlu1 %1144, %v308_v3  }
  0xaa   :  { %v631_v15 = vadd.f32 %v630_v12, %v629_v6  ;;  %387 = vperm.xlu2 %1145, %v293_v9   ;;  %382 = vperm.xlu0 %1143, %v292_v10   ;;  %v644_v6 = vrot.slane %v643_v61, 4 }
  0xab   :  { %v408_v17 = vpop.permute.xlu1 %407 }
  0xac   :  { %v632_v8 = vrot.slane %v631_v15, 2  ;;  %v423_v19 = vpop.permute.xlu2 %422  ;;  %v328_v21 = vpop.permute.xlu0 %327  ;;  %v489_v32 = vmul.f32 %v1094_v28, %v408_v17  ;;  %v538_v28 = vsel %vm502_vm2, %v475_v16, 0.0 }
  0xad   :  { %v473_v24 = vmul.f32 %v1078_v22, %v328_v21  ;;  %v1081_v21 = vsel %vm188_vm1, 1.0, %v1235_v54  ;;  %v539_v34 = vrot.slane %v538_v28, 4 }
  0xae   :  { %v633_v26 = vadd.f32 %v632_v8, %v631_v15  ;;  %v636_v47 = vsel %vm502_vm2, %v489_v32, 0.0 }
  0xaf   :  { %v524_v29 = vsel %vm502_vm2, %v473_v24, 0.0  ;;  %v637_v57 = vrot.slane %v636_v47, 4  ;;  %v540_v53 = vadd.f32 %v539_v34, %v538_v28 }
  0xb0   :  { %v634_v31 = vrot.slane %v633_v26, 1  ;;  %v525_v33 = vrot.slane %v524_v29, 4 }
  0xb1   :  { %v638_v0 = vadd.f32 %v637_v57, %v636_v47 }
  0xb2   :  { %v635_v36 = vadd.f32 %v634_v31, %v633_v26  ;;  %v526_v37 = vadd.f32 %v525_v33, %v524_v29  ;;  %467 = vperm.xlu0 %1143, %v309_v5  }
  0xb3   :  { %v333_v44 = vpop.permute.xlu1 %332  ;;  %v639_v12 = vrot.slane %v638_v0, 2 }
  0xb4   :  { %v1573_v45 = vsel %vm769_vm8, %v635_v36, %v788_v39  ;;  %v527_v48 = vrot.slane %v526_v37, 2  ;;  %v1576_v49 = vpop.permute.xlu2 %159  ;;  %v154_v51 = vpop.permute.xlu0 %153  ;;  %v474_v10 = vmul.f32 %v1079_v42, %v333_v44 }
  0xb5   :  { %vm204_vm12 = vcmp.eq.s32.totalorder %v154_v51, %v1440_v50  ;;  %v640_v18 = vadd.f32 %v639_v12, %v638_v0  ;;  %vm206_vm15 = vcmp.eq.s32.totalorder %v1576_v49, %v1440_v50 }
  0xb6   :  { %v528_v55 = vadd.f32 %v527_v48, %v526_v37  ;;  %v1097_v56 = vsel %vm204_vm12, 1.0, %v1235_v54  ;;  %v531_v17 = vsel %vm502_vm2, %v474_v10, 0.0 }
  0xb7   :  { %v492_v59 = vmul.f32 %v1097_v56, %v423_v19  ;;  %v532_v7 = vrot.slane %v531_v17, 4  ;;  %v641_v62 = vrot.slane %v640_v18, 1 }
  0xb8   :  { %v529_v58 = vrot.slane %v528_v55, 1 }
  0xb9   :  { %v657_v40 = vsel %vm502_vm2, %v492_v59, 0.0  ;;  %v533_v35 = vadd.f32 %v532_v7, %v531_v17  ;;  %v642_v39 = vadd.f32 %v641_v62, %v640_v18 }
  0xba   :  { %v530_v63 = vadd.f32 %v529_v58, %v528_v55  ;;  %v658_v13 = vrot.slane %v657_v40, 4 }
  0xbb   :  { %v157_v41 = vpop.permute.xlu1 %156  ;;  %v534_v55 = vrot.slane %v533_v35, 2  ;;  %v790_v59 = vsel %vm771_vm13, %v642_v39, %v1573_v45 }
  0xbc   :  { %vm205_vm0 = vcmp.eq.s32.totalorder %v157_v41, %v1440_v50  ;;  %v428_v1 = vpop.permute.xlu2 %427  ;;  %v1591_v3 = vpop.permute.xlu0 %108  ;;  %v1595_v4 = vsel %vm771_vm13, %v530_v63, %v1525_v2  ;;  %v645_v2 = vadd.f32 %v644_v6, %v643_v61  ;;  %v659_v8 = vadd.f32 %v658_v13, %v657_v40 }
  0xbd   :  { %v1098_v9 = vsel %vm205_vm0, 1.0, %v1235_v54  ;;  %vm189_vm5 = vcmp.eq.s32.totalorder %v1591_v3, %v1440_v50  ;;  %v541_v41 = vrot.slane %v540_v53, 2  ;;  %v535_v40 = vadd.f32 %v534_v55, %v533_v35 }
  0xbe   :  { %v493_v11 = vmul.f32 %v1098_v9, %v428_v1  ;;  %v646_v26 = vrot.slane %v645_v2, 2  ;;  %v660_v29 = vrot.slane %v659_v8, 2  ;;  %v1082_v45 = vsel %vm189_vm5, 1.0, %v1235_v54 }
  0xc0   :  { %v664_v14 = vsel %vm502_vm2, %v493_v11, 0.0  ;;  %v647_v33 = vadd.f32 %v646_v26, %v645_v2  ;;  %v661_v43 = vadd.f32 %v660_v29, %v659_v8  ;;  %v536_v2 = vrot.slane %v535_v40, 1 }
  0xc1   :  { %v665_v15 = vrot.slane %v664_v14, 4 }
  0xc2   :  { %v648_v52 = vrot.slane %v647_v33, 1  ;;  %v662_v58 = vrot.slane %v661_v43, 1 }
  0xc3   :  { %v343_v19 = vpop.permute.xlu1 %342  ;;  %v666_v22 = vadd.f32 %v665_v15, %v664_v14 }
  0xc4   :  { %v476_v23 = vmul.f32 %v1081_v21, %v343_v19  ;;  %v1608_v24 = vpop.permute.xlu2 %120  ;;  %v418_v20 = vpop.permute.xlu0 %417  ;;  %v649_v0 = vadd.f32 %v648_v52, %v647_v33  ;;  %v663_v10 = vadd.f32 %v662_v58, %v661_v43  ;;  %v542_v19 = vadd.f32 %v541_v41, %v540_v53 }
  0xc5   :  { %v491_v27 = vmul.f32 %v1096_v25, %v418_v20  ;;  %v667_v31 = vrot.slane %v666_v22, 2  ;;  %vm193_vm1 = vcmp.eq.s32.totalorder %v1608_v24, %v1440_v50 }
  0xc6   :  { %v545_v5 = vsel %vm502_vm2, %v476_v23, 0.0  ;;  %v791_v11 = vsel %vm773_vm4, %v649_v0, %v790_v59  ;;  %v537_v23 = vadd.f32 %v536_v2, %v535_v40  ;;  %v543_v26 = vrot.slane %v542_v19, 1 }
  0xc7   :  { %v650_v30 = vsel %vm502_vm2, %v491_v27, 0.0  ;;  %v546_v36 = vrot.slane %v545_v5, 4  ;;  %v668_v38 = vadd.f32 %v667_v31, %v666_v22 }
  0xc8   :  { %v651_v32 = vrot.slane %v650_v30, 4  ;;  %v774_v31 = vsel %vm773_vm4, %v537_v23, %v1595_v4 }
  0xc9   :  { %v547_v56 = vadd.f32 %v546_v36, %v545_v5  ;;  %v669_v61 = vrot.slane %v668_v38, 1 }
  0xca   :  { %v652_v37 = vadd.f32 %v651_v32, %v650_v30  ;;  %v544_v32 = vadd.f32 %v543_v26, %v542_v19 }
  0xcb   :  { %v115_v44 = vpop.permute.xlu1 %114  ;;  %v548_v1 = vrot.slane %v547_v56, 2  ;;  %v670_v13 = vadd.f32 %v669_v61, %v668_v38 }
  0xcc   :  { %v653_v47 = vrot.slane %v652_v37, 2  ;;  %v358_v48 = vpop.permute.xlu2 %357  ;;  %v112_v51 = vpop.permute.xlu0 %111  ;;  %vm191_vm6 = vcmp.eq.s32.totalorder %v115_v44, %v1440_v50  ;;  %v776_v36 = vsel %vm775_vm9, %v544_v32, %v774_v31  ;;  %v1086_v32 = vsel %vm193_vm1, 1.0, %v1235_v54 }
  0xcd   :  { %v1084_v42 = vsel %vm191_vm6, 1.0, %v1235_v54  ;;  %v549_v16 = vadd.f32 %v548_v1, %v547_v56  ;;  %vm190_vm12 = vcmp.eq.s32.totalorder %v112_v51, %v1440_v50 }
  0xce   :  { %v654_v57 = vadd.f32 %v653_v47, %v652_v37  ;;  %v479_v17 = vmul.f32 %v1084_v42, %v358_v48  ;;  %v1083_v43 = vsel %vm190_vm12, 1.0, %v1235_v54 }
  0xcf   :  { %v550_v20 = vrot.slane %v549_v16, 1 }
  0xd0   :  { %v655_v63 = vrot.slane %v654_v57, 1  ;;  %v566_v25 = vsel %vm502_vm2, %v479_v17, 0.0 }
  0xd1   :  { %v567_v29 = vrot.slane %v566_v25, 4  ;;  %v551_v30 = vadd.f32 %v550_v20, %v549_v16 }
  0xd2   :  { %v656_v6 = vadd.f32 %v655_v63, %v654_v57  ;;  %v1099_v63 = vsel %vm206_vm15, 1.0, %v1235_v54 }
  0xd3   :  { %v348_v9 = vpop.permute.xlu1 %347  ;;  %v568_v34 = vadd.f32 %v567_v29, %v566_v25  ;;  %v778_v37 = vsel %vm777_vm10, %v551_v30, %v776_v36 }
  0xd4   :  { %v477_v3 = vmul.f32 %v1082_v45, %v348_v9  ;;  %v1622_v60 = vpop.permute.xlu2 %123  ;;  %v163_v12 = vpop.permute.xlu0 %162  ;;  %v792_v14 = vsel %vm775_vm9, %v656_v6, %v791_v11 }
  0xd5   :  { %v793_v15 = vsel %vm777_vm10, %v663_v10, %v792_v14  ;;  %v569_v4 = vrot.slane %v568_v34, 2  ;;  %vm207_vm14 = vcmp.eq.s32.totalorder %v163_v12, %v1440_v50 }
  0xd6   :  { %v552_v18 = vsel %vm502_vm2, %v477_v3, 0.0  ;;  %v794_v8 = vsel %vm779_vm11, %v670_v13, %v793_v15  ;;  %v1100_v58 = vsel %vm207_vm14, 1.0, %v1235_v54 }
  0xd7   :  { %v553_v21 = vrot.slane %v552_v18, 4  ;;  %1109 = vmatmul.msk.f32.vlgmr.msra.gmra.mxu3 %vm502_vm2, %v794_v8  ;;  %v570_v53 = vadd.f32 %v569_v4, %v568_v34 }
  0xd9   :  { %v554_v22 = vadd.f32 %v553_v21, %v552_v18  ;;  %v571_v0 = vrot.slane %v570_v53, 1 }
  0xdb   :  { %v555_v7 = vrot.slane %v554_v22, 2  ;;  %v1630_v27 = vpop.permute.xlu1 %165  ;;  %v572_v10 = vadd.f32 %v571_v0, %v570_v53 }
  0xdc   :  { %v1632_v28 = vpop.permute.xlu2 %442  ;;  %v1634_v62 = vpop.permute.xlu0 %117  ;;  %vm208_vm3 = vcmp.eq.s32.totalorder %v1630_v27, %v1440_v50 }
  0xdd   :  { %v556_v5 = vadd.f32 %v555_v7, %v554_v22  ;;  %vm192_vm0 = vcmp.eq.s32.totalorder %v1634_v62, %v1440_v50  ;;  %v1101_v62 = vsel %vm208_vm3, 1.0, %v1235_v54 }
  0xde   :  { %v1085_v30 = vsel %vm192_vm0, 1.0, %v1235_v54 }
  0xdf   :  { %v557_v33 = vrot.slane %v556_v5, 1 }
  0xe1   :  { %v558_v35 = vadd.f32 %v557_v33, %v556_v5 }
  0xe3   :  { %v353_v39 = vpop.permute.xlu1 %352  ;;  %v780_v44 = vsel %vm779_vm11, %v558_v35, %v778_v37  ;;  %v496_v37 = vmul.f32 %v1101_v62, %v1632_v28 }
  0xe4   :  { %v478_v38 = vmul.f32 %v1083_v43, %v353_v39  ;;  %v368_v47 = vpop.permute.xlu2 %367  ;;  %v1643_v48 = vpop.permute.xlu0 %168  ;;  %1107 = vmatmul.msk.f32.vlgmr.msra.gmra.mxu0 %vm502_vm2, %v780_v44 }
  0xe5   :  { %v481_v33 = vmul.f32 %v1086_v32, %v368_v47  ;;  %vm209_vm5 = vcmp.eq.s32.totalorder %v1643_v48, %v1440_v50  ;;  %v685_v53 = vsel %vm502_vm2, %v496_v37, 0.0 }
  0xe6   :  { %v559_v51 = vsel %vm502_vm2, %v478_v38, 0.0  ;;  %v1102_v38 = vsel %vm209_vm5, 1.0, %v1235_v54  ;;  %v686_v0 = vrot.slane %v685_v53, 4 }
  0xe7   :  { %v560_v52 = vrot.slane %v559_v51, 4 }
  0xe9   :  { %v561_v55 = vadd.f32 %v560_v52, %v559_v51 }
  0xeb   :  { %v562_v56 = vrot.slane %v561_v55, 2  ;;  %v438_v57 = vpop.permute.xlu1 %437 }
  0xec   :  { %v495_v59 = vmul.f32 %v1100_v58, %v438_v57  ;;  %v433_v61 = vpop.permute.xlu0 %432  ;;  %v1653_v6 = vpop.permute.xlu2 %177 }
  0xed   :  { %v563_v41 = vadd.f32 %v562_v56, %v561_v55  ;;  %v494_v40 = vmul.f32 %v1099_v63, %v433_v61  ;;  %vm212_vm0 = vcmp.eq.s32.totalorder %v1653_v6, %v1440_v50 }
  0xee   :  { %v678_v1 = vsel %vm502_vm2, %v495_v59, 0.0 }
  0xef   :  { %v564_v42 = vrot.slane %v563_v41, 1  ;;  %v679_v9 = vrot.slane %v678_v1, 4  ;;  %v671_v49 = vsel %vm502_vm2, %v494_v40, 0.0 }
  0xf0   :  { %v672_v45 = vrot.slane %v671_v49, 4 }
  0xf1   :  { %v565_v11 = vadd.f32 %v564_v42, %v563_v41  ;;  %v680_v3 = vadd.f32 %v679_v9, %v678_v1 }
  0xf2   :  { %v673_v12 = vadd.f32 %v672_v45, %v671_v49  ;;  %v846_v45 = vld [vmem:[%s1789_s4 + $0x18] sm:$0xff] }
  0xf3   :  { %v1657_v13 = vsel %vm767_vm7, %v572_v10, %v565_v11  ;;  %v681_v14 = vrot.slane %v680_v3, 2  ;;  %v363_v2 = vpop.permute.xlu1 %362  ;;  %v845_v10 = vld [vmem:[%s1789_s4 + $0x10] sm:$0xff]  ;;  %866 = vmatpush.msra.mxu1 %v846_v45 }
  0xf4   :  { %v674_v15 = vrot.slane %v673_v12, 2  ;;  %v172_v16 = vpop.permute.xlu0 %171  ;;  %v133_v21 = vpop.permute.xlu2 %132  ;;  %v480_v31 = vmul.f32 %v1085_v30, %v363_v2  ;;  %v1105_v30 = vsel %vm212_vm0, 1.0, %v1235_v54  ;;  %vm1040_vm0 = vcmask 57344  }
  0xf5   :  { %v682_v17 = vadd.f32 %v681_v14, %v680_v3  ;;  %vm197_vm6 = vcmp.eq.s32.totalorder %v133_v21, %v1440_v50  ;;  %vm210_vm12 = vcmp.eq.s32.totalorder %v172_v16, %v1440_v50  ;;  %v844_v16 = vld [vmem:[%s1789_s4 + $0x8] sm:$0xff]  ;;  %867 = vmatpush.msra.mxu1 %v845_v10 }
  0xf6   :  { %v675_v18 = vadd.f32 %v674_v15, %v673_v12  ;;  %v573_v34 = vsel %vm502_vm2, %v480_v31, 0.0  ;;  %v1090_v44 = vsel %vm197_vm6, 1.0, %v1235_v54  ;;  %v1103_v47 = vsel %vm210_vm12, 1.0, %v1235_v54 }
  0xf7   :  { %v683_v8 = vrot.slane %v682_v17, 1  ;;  %v574_v39 = vrot.slane %v573_v34, 4  ;;  %868 = vmatpush.msra.mxu1 %v844_v16 }
  0xf8   :  { %v676_v19 = vrot.slane %v675_v18, 1 }
  0xf9   :  { %v684_v22 = vadd.f32 %v683_v8, %v682_v17  ;;  %v575_v55 = vadd.f32 %v574_v39, %v573_v34  ;;  %v687_v17 = vadd.f32 %v686_v0, %v685_v53 }
  0xfa   :  { %v677_v23 = vadd.f32 %v676_v19, %v675_v18 }
  0xfb   :  { %v175_v20 = vpop.permute.xlu1 %174  ;;  %v576_v9 = vrot.slane %v575_v55, 2  ;;  %v688_v31 = vrot.slane %v687_v17, 2 }
  0xfc   :  { %v1660_v25 = vsel %vm767_vm7, %v684_v22, %v677_v23  ;;  %v127_v26 = vpop.permute.xlu0 %126  ;;  %v458_v7 = vpop.permute.xlu2 %457  ;;  %vm194_vm7 = vcmp.eq.s32.totalorder %v1622_v60, %v1440_v50  ;;  %v580_v60 = vsel %vm502_vm2, %v481_v33, 0.0  ;;  %vm211_vm14 = vcmp.eq.s32.totalorder %v175_v20, %v1440_v50 }
  0xfd   :  { %v1087_v36 = vsel %vm194_vm7, 1.0, %v1235_v54  ;;  %v581_v52 = vrot.slane %v580_v60, 4  ;;  %vm195_vm15 = vcmp.eq.s32.totalorder %v127_v26, %v1440_v50  ;;  %v1104_v56 = vsel %vm211_vm14, 1.0, %v1235_v54 }
  0xfe   :  { %v1088_v63 = vsel %vm195_vm15, 1.0, %v1235_v54  ;;  %v499_v49 = vmul.f32 %v1104_v56, %v458_v7  ;;  %v577_v8 = vadd.f32 %v576_v9, %v575_v55  ;;  %vm1031_vm14 = vcmask 64512  }
  0xff   :  { %v582_v41 = vadd.f32 %v581_v52, %v580_v60 }
 0x100   :  { %v706_v19 = vsel %vm502_vm2, %v499_v49, 0.0 }
 0x101   :  { %v583_v18 = vrot.slane %v582_v41, 2  ;;  %v707_v32 = vrot.slane %v706_v19, 4 }
 0x103   :  { %v1664_v29 = vpop.permute.xlu1 %129  ;;  %v584_v34 = vadd.f32 %v583_v18, %v582_v41 }
 0x104   :  { %v448_v5 = vpop.permute.xlu0 %447  ;;  %v388_v35 = vpop.permute.xlu2 %387  ;;  %vm196_vm1 = vcmp.eq.s32.totalorder %v1664_v29, %v1440_v50 }
 0x105   :  { %v485_v48 = vmul.f32 %v1090_v44, %v388_v35  ;;  %v497_v4 = vmul.f32 %v1102_v38, %v448_v5  ;;  %v1089_v62 = vsel %vm196_vm1, 1.0, %v1235_v54  ;;  %v689_v38 = vadd.f32 %v688_v31, %v687_v17 }
 0x107   :  { %v608_v58 = vsel %vm502_vm2, %v485_v48, 0.0  ;;  %v692_v59 = vsel %vm502_vm2, %v497_v4, 0.0  ;;  %v585_v4 = vrot.slane %v584_v34, 1 }
 0x108   :  { %v609_v11 = vrot.slane %v608_v58, 4  ;;  %v693_v3 = vrot.slane %v692_v59, 4 }
 0x10a   :  { %v610_v22 = vadd.f32 %v609_v11, %v608_v58  ;;  %v694_v23 = vadd.f32 %v693_v3, %v692_v59 }
 0x10b   :  { %v453_v24 = vpop.permute.xlu1 %452 }
 0x10c   :  { %v373_v27 = vpop.permute.xlu0 %372  ;;  %v498_v28 = vmul.f32 %v1103_v47, %v453_v24  ;;  %v578_v24 = vrot.slane %v577_v8, 1  ;;  %v611_v29 = vrot.slane %v610_v22, 2  ;;  %v708_v47 = vadd.f32 %v707_v32, %v706_v19 }
 0x10d   :  { %v482_v43 = vmul.f32 %v1087_v36, %v373_v27  ;;  %v695_v27 = vrot.slane %v694_v23, 2 }
 0x10e   :  { %v699_v40 = vsel %vm502_vm2, %v498_v28, 0.0  ;;  %v612_v28 = vadd.f32 %v611_v29, %v610_v22 }
 0x10f   :  { %v587_v51 = vsel %vm502_vm2, %v482_v43, 0.0  ;;  %v700_v2 = vrot.slane %v699_v40, 4  ;;  %v696_v53 = vadd.f32 %v695_v27, %v694_v23 }
 0x110   :  { %v588_v57 = vrot.slane %v587_v51, 4 }
 0x111   :  { %v701_v26 = vadd.f32 %v700_v2, %v699_v40  ;;  %v690_v40 = vrot.slane %v689_v38, 1  ;;  %v697_v45 = vrot.slane %v696_v53, 1 }
 0x112   :  { %v589_v12 = vadd.f32 %v588_v57, %v587_v51  ;;  %v579_v51 = vadd.f32 %v578_v24, %v577_v8 }
 0x113   :  { %v378_v61 = vpop.permute.xlu1 %377  ;;  %v702_v60 = vrot.slane %v701_v26, 2  ;;  %v691_v18 = vadd.f32 %v690_v40, %v689_v38  ;;  %v698_v19 = vadd.f32 %v697_v45, %v696_v53  ;;  %v839_v38 = vld [vmem:[%s1788_s3] sm:$0xff] }
 0x114   :  { %v483_v1 = vmul.f32 %v1088_v63, %v378_v61  ;;  %v1695_v42 = vpop.permute.xlu0 %180  ;;  %v590_v20 = vrot.slane %v589_v12, 2  ;;  %v709_v61 = vrot.slane %v708_v47, 2  ;;  %v782_v9 = vsel %vm769_vm8, %v579_v51, %v1657_v13 }
 0x115   :  { %vm213_vm3 = vcmp.eq.s32.totalorder %v1695_v42, %v1440_v50  ;;  %v703_v57 = vadd.f32 %v702_v60, %v701_v26  ;;  %v613_v42 = vrot.slane %v612_v28, 1 }
 0x116   :  { %v594_v14 = vsel %vm502_vm2, %v483_v1, 0.0  ;;  %v591_v36 = vadd.f32 %v590_v20, %v589_v12  ;;  %v1106_v41 = vsel %vm213_vm3, 1.0, %v1235_v54  ;;  %v586_v1 = vadd.f32 %v585_v4, %v584_v34 }
 0x117   :  { %v595_v15 = vrot.slane %v594_v14, 4  ;;  %v704_v3 = vrot.slane %v703_v57, 1  ;;  %v614_v26 = vadd.f32 %v613_v42, %v612_v28  ;;  %vm999_vm3 = vcmask 7168  }
 0x118   :  { %v592_v55 = vrot.slane %v591_v36, 1  ;;  %v783_v8 = vsel %vm771_vm13, %v586_v1, %v782_v9 }
 0x119   :  { %v596_v21 = vadd.f32 %v595_v15, %v594_v14  ;;  %v710_v15 = vadd.f32 %v709_v61, %v708_v47  ;;  %v705_v23 = vadd.f32 %v704_v3, %v703_v57  ;;  %v1146_v57 = vld [vmem:[%s1790_s5] ss:$0 sm:$0xff] }
 0x11a   :  { %v593_v10 = vadd.f32 %v592_v55, %v591_v36 }
 0x11b   :  { %v597_v7 = vrot.slane %v596_v21, 2  ;;  %v463_v5 = vpop.permute.xlu1 %462 }
 0x11c   :  { %v500_v6 = vmul.f32 %v1105_v30, %v463_v5  ;;  %v383_v33 = vpop.permute.xlu0 %382  ;;  %v784_v13 = vsel %vm773_vm4, %v593_v10, %v783_v8  ;;  %v711_v5 = vrot.slane %v710_v15, 1 }
 0x11d   :  { %v484_v35 = vmul.f32 %v1089_v62, %v383_v33  ;;  %v598_v39 = vadd.f32 %v597_v7, %v596_v21 }
 0x11e   :  { %v713_v37 = vsel %vm502_vm2, %v500_v6, 0.0  ;;  %v796_v6 = vsel %vm769_vm8, %v691_v18, %v1660_v25  ;;  %v843_v25 = vld [vmem:[%s1789_s4] sm:$0xff] }
 0x11f   :  { %v714_v43 = vrot.slane %v713_v37, 4  ;;  %v601_v44 = vsel %vm502_vm2, %v484_v35, 0.0  ;;  %v599_v58 = vrot.slane %v598_v39, 1  ;;  %v797_v62 = vsel %vm771_vm13, %v698_v19, %v796_v6  ;;  %869 = vmatpush.msra.mxu1 %v843_v25 }
 0x120   :  { %v602_v48 = vrot.slane %v601_v44, 4  ;;  %v798_v24 = vsel %vm773_vm4, %v705_v23, %v797_v62  ;;  %v712_v35 = vadd.f32 %v711_v5, %v710_v15  ;;  %v1148_v62 = vld [vmem:[%s1792_s7 + $0x1] ss:$0 sm:$0xff] }
 0x121   :  { %v715_v52 = vadd.f32 %v714_v43, %v713_v37  ;;  %v600_v12 = vadd.f32 %v599_v58, %v598_v39  ;;  %v842_v39 = vld [vmem:[%s1788_s3 + $0x18] sm:$0xff]  ;;  %v841_v43 = vld [vmem:[%s1788_s3 + $0x10] sm:$0xff] }
 0x122   :  { %v603_v56 = vadd.f32 %v602_v48, %v601_v44  ;;  %v799_v36 = vsel %vm775_vm9, %v712_v35, %v798_v24  ;;  %895 = vmatpush.msra.mxu2 %v842_v39  ;;  %v840_v44 = vld [vmem:[%s1788_s3 + $0x8] sm:$0xff]  ;;  %v1150_v24 = vld [vmem:[%s1792_s7] ss:$0 sm:$0xff] }
 0x123   :  { %v716_v59 = vrot.slane %v715_v52, 2  ;;  %v785_v7 = vsel %vm775_vm9, %v600_v12, %v784_v13 }
 0x124   :  { %v604_v63 = vrot.slane %v603_v56, 2  ;;  %v468_v0 = vpop.permute.xlu0 %467  ;;  %896 = vmatpush.msra.mxu2 %v841_v43 }
 0x125   :  { %v501_v49 = vmul.f32 %v1106_v41, %v468_v0  ;;  %v717_v14 = vadd.f32 %v716_v59, %v715_v52 }
 0x126   :  { %v605_v11 = vadd.f32 %v604_v63, %v603_v56  ;;  %897 = vmatpush.msra.mxu2 %v840_v44  ;;  %v1026_v44 = vshrl.u32 %v52_v46, 7 }
 0x127   :  { %v720_v2 = vsel %vm502_vm2, %v501_v49, 0.0  ;;  %v718_v20 = vrot.slane %v717_v14, 1 }
 0x128   :  { %v606_v16 = vrot.slane %v605_v11, 1  ;;  %v721_v17 = vrot.slane %v720_v2, 4  ;;  %898 = vmatpush.msra.mxu2 %v839_v38  ;;  %v982_v38 = vstv %s1117_s2  ;;  %vm1027_vm6 = vcmp.eq.s32.totalorder %v1026_v44, %v1440_v50 }
 0x129   :  { %v719_v34 = vadd.f32 %v718_v20, %v717_v14 }
 0x12a   :  { %v607_v21 = vadd.f32 %v606_v16, %v605_v11  ;;  %v722_v22 = vadd.f32 %v721_v17, %v720_v2 }
 0x12b   :  { %v800_v37 = vsel %vm777_vm10, %v719_v34, %v799_v36  ;;  %v1149_v34 = vld [vmem:[%s1791_s6] ss:$0 sm:$0xff] }
 0x12c   :  { %v723_v30 = vrot.slane %v722_v22, 2  ;;  %v786_v31 = vsel %vm777_vm10, %v607_v21, %v785_v7 }
 0x12d   :  { %v787_v32 = vsel %vm779_vm11, %v614_v26, %v786_v31 }
 0x12e   :  { %v724_v33 = vadd.f32 %v723_v30, %v722_v22  ;;  %1108 = vmatmul.msk.f32.gmra.mxu0 %vm502_vm2, %v787_v32  ;;  %v1147_v32 = vld [vmem:[%s1791_s6 + $0x1] ss:$0 sm:$0xff] }
 0x130   :  { %v725_v29 = vrot.slane %v724_v33, 1 }
 0x132   :  { %v726_v27 = vadd.f32 %v725_v29, %v724_v33 }
 0x134   :  { %v801_v60 = vsel %vm779_vm11, %v726_v27, %v800_v37 }
 0x135   :  { %1110 = vmatmul.msk.f32.gmra.mxu3 %vm502_vm2, %v801_v60  ;;  %vm847_vm2 = vcmask 261120  }
 0x15a   :  { %v833_v47 = vpop.f32.mrf.mxu3 }
 0x15b   :  { %1111 = vmatmul.msk.f32.vlgmr.msra.gmra.mxu1 %vm847_vm2, %v833_v47 }
 0x161   :  { %v827_v48 = vpop.f32.mrf.mxu0 }
 0x162   :  { %1113 = vmatmul.msk.f32.vlgmr.msra.gmra.mxu2 %vm847_vm2, %v827_v48  ;;  %v952_v22 = vsub.f32 %v827_v48, %v833_v47  ;;  %v950_v5 = vadd.f32 %v833_v47, %v827_v48  ;;  %v969_v47 = vstv %s968_s22 }
 0x1ab   :  { %v830_v4 = vpop.f32.mrf.mxu0 }
 0x1ac   :  { %1114 = vmatmul.msk.f32.gmra.mxu2 %vm847_vm2, %v830_v4 }
 0x1b8   :  { %v836_v51 = vpop.f32.mrf.mxu3 }
 0x1b9   :  { %v951_v52 = vadd.f32 %v836_v51, %v830_v4  ;;  %v953_v28 = vsub.f32 %v830_v4, %v836_v51  ;;  %1112 = vmatmul.msk.f32.gmra.mxu1 %vm847_vm2, %v836_v51 }
 0x1d8   :  { %v871_v55 = vpop.f32.mrf.mxu1 }
 0x1e5   :  { %v900_v53 = vpop.f32.mrf.mxu2 }
 0x1e6   :  { %v901_v56 = vadd.f32 %v900_v53, %v871_v55 }
 0x1e8   :  { %v910_v58 = vadd.f32 %v1146_v57, %v901_v56 }
 0x1ea   :  { %v1115_v59 = vmul.f32 -1.442695, %v910_v58 }
 0x1ec   :  { %1151 = vpow2.f32 %v1115_v59 }
 0x1f2   :  { %v1152_v61 = vpop.eup %1151 }
 0x1f3   :  { %v918_v63 = vadd.f32 1.0, %v1152_v61 }
 0x1f5   :  { %1153 = vrcp.f32 %v918_v63  ;;  %v931_v14 = vand.u32 2147483648, %v918_v63  ;;  %vm925_vm13 = vweird.f32 %v918_v63  ;;  %v929_v2 = vand.u32 2147483647, %v918_v63 }
 0x1f7   :  { %v932_v18 = vor.u32 1.1754944e-38, %v931_v14  ;;  %vm930_vm9 = vcmp.eq.f32.partialorder %v929_v2, 8.507059e+37 }
 0x1fb   :  { %v1154_v9 = vpop.eup %1153 }
 0x1fc   :  { %v921_v42 = vmul.f32 %v1154_v9, %v918_v63  ;;  %vm926_vm8 = vweird.f32 %v1154_v9 }
 0x1fd   :  { %vm927_vm4 = vmor %vm925_vm13, %vm926_vm8  ;;  %vm1020_vm8 = vcmask 0  }
 0x1fe   :  { %v922_v45 = vsub.f32 1.0, %v921_v42 }
 0x200   :  { %v923_v3 = vmul.f32 %v1154_v9, %v922_v45 }
 0x202   :  { %v924_v12 = vadd.f32 %v1154_v9, %v923_v3 }
 0x204   :  { %v928_v17 = vsel %vm927_vm4, %v1154_v9, %v924_v12 }
 0x205   :  { %v933_v19 = vsel %vm930_vm9, %v932_v18, %v928_v17  ;;  %v1237_v18 = vmov 8.0  }
 0x206   :  { %v954_v26 = vmul.f32 %v952_v22, %v933_v19 }
 0x208   :  { %v956_v33 = vadd.f32 %v954_v26, %v950_v5 }
 0x20a   :  { %v973_v29 = vmul.f32 %v1147_v32, %v956_v33  ;;  %v960_v36 = vmul.f32 %v1149_v34, %v956_v33 }
 0x22f   :  { %v903_v0 = vpop.f32.mrf.mxu2 }
 0x236   :  { %v874_v41 = vpop.f32.mrf.mxu1 }
 0x237   :  { %v904_v40 = vadd.f32 %v903_v0, %v874_v41 }
 0x239   :  { %v911_v1 = vadd.f32 %v1146_v57, %v904_v40 }
 0x23b   :  { %v1116_v49 = vmul.f32 -1.442695, %v911_v1 }
 0x23d   :  { %1155 = vpow2.f32 %v1116_v49 }
 0x243   :  { %v1156_v10 = vpop.eup %1155 }
 0x244   :  { %v919_v11 = vadd.f32 1.0, %v1156_v10 }
 0x246   :  { %1157 = vrcp.f32 %v919_v11  ;;  %v946_v21 = vand.u32 2147483648, %v919_v11  ;;  %v944_v23 = vand.u32 2147483647, %v919_v11  ;;  %vm940_vm11 = vweird.f32 %v919_v11 }
 0x248   :  { %v947_v7 = vor.u32 1.1754944e-38, %v946_v21  ;;  %vm945_vm5 = vcmp.eq.f32.partialorder %v944_v23, 8.507059e+37 }
 0x24c   :  { %v1158_v15 = vpop.eup %1157 }
 0x24d   :  { %v936_v16 = vmul.f32 %v1158_v15, %v919_v11  ;;  %vm941_vm10 = vweird.f32 %v1158_v15  ;;  %v995_v11 = vld [vmem:[%s1794_s9] sm:$0xff]  ;;  %s1238_s9 = smov [#allocation5]  }
 0x24e   :  { %vm942_vm7 = vmor %vm940_vm11, %vm941_vm10  ;;  %vm996_vm1 = vcmp.eq.s32.totalorder %v995_v11, 1  ;;  %s1047_s11 = sshll.u32 %s1238_s9, 4  ;;  %s1048_s11 = int_to_ptr.vmem [resolvable:$true] %s1047_s11 }
 0x24f   :  { %v937_v8 = vsub.f32 1.0, %v936_v16 }
 0x251   :  { %v938_v13 = vmul.f32 %v1158_v15, %v937_v8 }
 0x253   :  { %v939_v20 = vadd.f32 %v1158_v15, %v938_v13 }
 0x255   :  { %v943_v30 = vsel %vm942_vm7, %v1158_v15, %v939_v20 }
 0x256   :  { %v948_v31 = vsel %vm945_vm5, %v947_v7, %v943_v30 }
 0x257   :  { %v955_v6 = vmul.f32 %v953_v28, %v948_v31  ;;  %v1119_v28 = vsel %vm1027_vm6, 1.0, %v1235_v54 }
 0x259   :  { %v957_v35 = vadd.f32 %v955_v6, %v951_v52 }
 0x25b   :  { %v976_v27 = vmul.f32 %v1148_v62, %v957_v35  ;;  %v963_v37 = vmul.f32 %v1150_v24, %v957_v35 }
 0x25d   :  { %v977_v60 = vadd.f32 %v976_v27, %v973_v29  ;;  %v964_v25 = vadd.f32 %v963_v37, %v960_v36 }
 0x25f   :  { %v978_v39 = vsel %vm847_vm2, %v977_v60, 0.0  ;;  %v965_v43 = vsel %vm847_vm2, %v964_v25, 0.0 }
 0x260   :  { %979 = vadd.xlane.f32.xlu2 %v978_v39  ;;  %966 = vadd.xlane.f32.xlu1 %v965_v43 }
 0x2d3   :  { %v980_v48 = vpop.xlane.xlu2 %979  ;;  %v967_v4 = vpop.xlane.xlu1 %966 }
 0x2d4   :  { %v983_v51 = vadd.f32 %v982_v38, %v980_v48  ;;  %v970_v52 = vadd.f32 %v969_v47, %v967_v4 }
 0x2d6   :  { %v984_v53 = vmax.f32 %v970_v52, %v983_v51  ;;  %vm1022_vm12 = vcmp.gt.f32.partialorder %v983_v51, %v970_v52  ;;  %v997_v15 = vsel %vm996_vm1, %v983_v51, %v970_v52 }
 0x2d7   :  { %v1118_v55 = vsel %vm1022_vm12, 1.0, %v1235_v54 }
 0x2d8   :  { %v985_v56 = vsub.f32 %v970_v52, %v984_v53  ;;  %v988_v57 = vsub.f32 %v983_v51, %v984_v53  ;;  %v1030_v58 = vmul.f32 %v1119_v28, %v1118_v55 }
 0x2da   :  { %v986_v59 = vmul.f32 1.442695, %v985_v56  ;;  %v989_v46 = vmul.f32 1.442695, %v988_v57  ;;  %v1032_v61 = vsel %vm1031_vm14, %v1030_v58, 0.0 }
 0x2db   :  { %v1033_v63 = vrot.slane %v1032_v61, 4 }
 0x2dc   :  { %1159 = vpow2.f32 %v986_v59 }
 0x2dd   :  { %1161 = vpow2.f32 %v989_v46  ;;  %v1034_v50 = vadd.f32 %v1033_v63, %v1032_v61 }
 0x2df   :  { %v1035_v0 = vrot.slane %v1034_v50, 2 }
 0x2e1   :  { %v1036_v41 = vadd.f32 %v1035_v0, %v1034_v50 }
 0x2e2   :  { %v1160_v40 = vpop.eup %1159 }
 0x2e3   :  { %v1162_v1 = vpop.eup %1161  ;;  %v1037_v9 = vrot.slane %v1036_v41, 1 }
 0x2e4   :  { %v991_v49 = vadd.f32 %v1162_v1, %v1160_v40 }
 0x2e5   :  { %v1038_v42 = vadd.f32 %v1037_v9, %v1036_v41 }
 0x2e6   :  { %1163 = vlog2.f32 %v991_v49 }
 0x2e7   :  { %vm1132_vm15 = vcmp.lt.s32.totalorder %v1038_v42, 0  ;;  %v1133_v54 = vceil.f32 %v1038_v42  ;;  %v1134_v45 = vfloor.f32 %v1038_v42  ;;  %1165 = vrcp.f32 %v1237_v18 }
 0x2e9   :  { %v1135_v10 = vsel %vm1132_vm15, %v1133_v54, %v1134_v45 }
 0x2ea   :  { %v1136_v3 = vcvt.f32.s32 %v1135_v10 }
 0x2ec   :  { %v1164_v12 = vpop.eup %1163  ;;  %1041 = vst.msk [vmem:[#allocation6] sm:$0x1] %vm1040_vm0, %v1136_v3 }
 0x2ed   :  { %v993_v14 = vmul.f32 0.6931472, %v1164_v12  ;;  %1063 = dma.vmem_to_hbm [thread:$0]  %s1059_s24, 16, %s1061_s8, [#allocation7]   ;;  %v1166_v8 = vpop.eup %1165 }
 0x2ee   :  { %v1011_v19 = vmul.f32 8.0, %v1166_v8  ;;  %vm1015_vm2 = vweird.f32 %v1166_v8 }
 0x2ef   :  { %v994_v2 = vadd.f32 %v993_v14, %v984_v53 }
 0x2f0   :  { %v1012_v21 = vsub.f32 1.0, %v1011_v19 }
 0x2f1   :  { %v998_v16 = vsub.f32 %v994_v2, %v997_v15 }
 0x2f2   :  { %v1013_v20 = vmul.f32 %v1166_v8, %v1012_v21 }
 0x2f3   :  { %v1000_v17 = vsel %vm999_vm3, %v998_v16, 0.0 }
 0x2f4   :  { %1001 = vadd.xlane.f32.xlu0 %v1000_v17  ;;  %v1014_v5 = vadd.f32 %v1166_v8, %v1013_v20 }
 0x2f6   :  { %v1016_v32 = vsel %vm1015_vm2, %v1166_v8, %v1014_v5 }
 0x367   :  { %v1002_v22 = vpop.xlane.xlu0 %1001 }
 0x368   :  { %v1003_v13 = vrot.slane %v1002_v22, 4 }
 0x36a   :  { %v1004_v23 = vadd.f32 %v1003_v13, %v1002_v22 }
 0x36c   :  { %v1005_v26 = vrot.slane %v1004_v23, 2 }
 0x36e   :  { %v1006_v7 = vadd.f32 %v1005_v26, %v1004_v23 }
 0x370   :  { %v1007_v30 = vrot.slane %v1006_v7, 1 }
 0x372   :  { %v1008_v31 = vadd.f32 %v1007_v30, %v1006_v7 }
 0x374   :  { %1128 = vpush %v1008_v31 }
 0x375   :  { %1130 = vpush %v1016_v32 }
 0x3a5   :  { %s1129_s27 = spop %1128 }
 0x3a6   :  { %s1131_s12 = spop %1130 }
 0x3a7   :  { %s1018_s13 = smul.f32 %s1131_s12, %s1129_s27 }
 0x3a9   :  { %v1019_v6 = vstv %s1018_s13 }
 0x3aa   :  { %1021 = vst.msk [vmem:[#allocation5] sm:$0x1] %vm1020_vm8, %v1019_v6 }
 0x3ab   :  { %1052 = dma.vmem_to_hbm [thread:$0]  %s1048_s11, 16, %s1050_s30, [#allocation3]  }
 0x3ac   :  { %1229 = dma.done.wait [#allocation3], 16  }
 0x3ad   :  { %1230 = vsyncadd [#allocation3], 4294967280 }
 0x3ae   :  { %1231 = dma.done.wait [#allocation7], 16  }
 0x3af   :  { %1232 = vsyncadd [#allocation7], 4294967280 }
 0x3b0   :  { %1072 = vsyncpa [#allocation3], 1 }
 0x3b1   :  { %1073 = vsyncpa [#allocation7], 1 }
 0x3b2   :  { %1074 = vsyncpa [#allocation4], 1 }

</bundles_post_ra>
